<compile_context>
chip_gen: v5e
topology: v5e:2x2
jax: 0.10.0
libtpu: 0.0.40
codegen_flags: <defaults>
</compile_context>

<pallas_src>
import functools

import jax
import jax.numpy as jnp
from jax.experimental import pallas as pl
from jax.experimental.pallas import tpu as pltpu


def _cdiv(a: int, b: int) -> int:
    return (a + b - 1) // b


def _round_up(a: int, b: int) -> int:
    return _cdiv(a, b) * b


@functools.lru_cache(maxsize=1)
def _vmem_capacity_bytes() -> int:
    try:
        return int(pltpu.get_tpu_info().vmem_capacity_bytes)
    except Exception:
        return 64 * 1024 * 1024  # conservative (v7x-sized) fallback


def _tile_axis(dim: int, cap: int, align: int):
    """Balanced tiling of `dim` into tiles of size <= ~cap.

    Returns (tile, num_tiles, padded_dim). If the whole axis fits in one tile, the exact
    dim is used as the block size (full-dim blocks are always legal), so that axis needs
    no padding pass at all.
    """
    aligned = _round_up(dim, align)
    if aligned <= cap:
        return dim, 1, dim
    num = _cdiv(aligned, cap)
    tile = _round_up(_cdiv(aligned, num), align)
    return tile, num, tile * num


# ---------------------------------------------------------------------------
# Kernels: out[i, j] = sum_k x[i, k] * w_t[k, j]   (w_t = weight.T, shape (K, N))
# ---------------------------------------------------------------------------

def _linear_kernel_single_k(x_ref, w_ref, o_ref):
    # Whole K contraction fits in one tile: no accumulation state needed.
    o_ref[...] = jnp.dot(
        x_ref[...], w_ref[...], preferred_element_type=jnp.float32
    ).astype(o_ref.dtype)


def _linear_kernel_acc_into_out(x_ref, w_ref, o_ref):
    # f32 output: accumulate directly into the VMEM-resident output tile
    # (its block index is constant across the K grid axis -> no re-DMA per k step).
    @pl.when(pl.program_id(2) == 0)
    def _():
        o_ref[...] = jnp.zeros_like(o_ref)

    o_ref[...] += jnp.dot(x_ref[...], w_ref[...], preferred_element_type=jnp.float32)


def _linear_kernel_acc_scratch(x_ref, w_ref, o_ref, acc_ref):
    # Non-f32 output: classic f32 scratch accumulator, cast on the final K step.
    @pl.when(pl.program_id(2) == 0)
    def _():
        acc_ref[...] = jnp.zeros_like(acc_ref)

    acc_ref[...] += jnp.dot(x_ref[...], w_ref[...], preferred_element_type=jnp.float32)

    @pl.when(pl.program_id(2) == pl.num_programs(2) - 1)
    def _():
        o_ref[...] = acc_ref[...].astype(o_ref.dtype)


def regression_model_forward(x, weight, *, cast_to_bf16=False,
                             tm_max=None, tn_max=None, tk_max=None):
    """x: (B, input_dim); weight: (output_dim, input_dim) in PyTorch Linear layout.

    Returns x @ weight.T with shape (B, output_dim).
    """
    B, K = x.shape
    N, K2 = weight.shape
    assert K == K2, f"input_dim mismatch: {K} vs {K2}"

    out_dtype = x.dtype

    # One-time wrapper transpose to (K, N): the kernel then contracts ((1,),(0,)),
    # a plain MXU matmul with no transposed RHS inside the grid loop.
    w_t = weight.T

    compute_dtype = jnp.bfloat16 if cast_to_bf16 else x.dtype
    itemsize = jnp.dtype(compute_dtype).itemsize
    sub = {4: 8, 2: 16, 1: 32}.get(itemsize, 8)  # sublane multiple for the compute dtype

    # Generation-aware tile caps + VMEM budget.
    vmem_cap = _vmem_capacity_bytes()
    if vmem_cap >= 100 * 1024 * 1024:            # v5e / v6e: 128 MiB VMEM per core
        d_tm, d_tn, d_tk = 512, 1024, 1024
        vmem_limit = min(vmem_cap - 24 * 1024 * 1024, 100 * 1024 * 1024)
    else:                                        # v7x (64 MiB VMEM) or unknown
        d_tm, d_tn, d_tk = 256, 512, 512
        vmem_limit = min((vmem_cap * 3) // 4, 48 * 1024 * 1024)
    tm_max = tm_max or d_tm
    tn_max = tn_max or d_tn
    tk_max = tk_max or d_tk

    tm, gm, m_pad = _tile_axis(B, tm_max, sub)    # M: sublane-aligned (or full dim)
    tn, gn, n_pad = _tile_axis(N, tn_max, 128)    # N: lane-aligned (or full dim)
    tk, gk, k_pad = _tile_axis(K, tk_max, 128)    # K: lane-aligned (or full dim)

    # Give v7x's two TensorCores at least two parallel grid points when possible
    # (costs one extra ~0.35us grid step on single-TC chips — negligible).
    if gm * gn == 1 and _round_up(B, sub) >= 2 * sub:
        gm = 2
        tm = _round_up(_cdiv(_round_up(B, sub), 2), sub)
        m_pad = tm * gm

    x_c = x.astype(compute_dtype) if compute_dtype != x.dtype else x
    w_c = w_t.astype(compute_dtype) if compute_dtype != w_t.dtype else w_t
    if m_pad != B or k_pad != K:
        x_c = jnp.pad(x_c, ((0, m_pad - B), (0, k_pad - K)))
    if k_pad != K or n_pad != N:
        w_c = jnp.pad(w_c, ((0, k_pad - K), (0, n_pad - N)))

    if gk == 1:
        kernel = _linear_kernel_single_k
        scratch = ()
    elif jnp.dtype(out_dtype) == jnp.float32:
        kernel = _linear_kernel_acc_into_out
        scratch = ()
    else:
        kernel = _linear_kernel_acc_scratch
        scratch = (pltpu.VMEM((tm, tn), jnp.float32),)

    out_padded = pl.pallas_call(
        kernel,
        out_shape=jax.ShapeDtypeStruct((m_pad, n_pad), out_dtype),
        grid_spec=pltpu.PrefetchScalarGridSpec(
            num_scalar_prefetch=0,
            grid=(gm, gn, gk),
            in_specs=[
                pl.BlockSpec((tm, tk), lambda i, j, k: (i, k)),   # x tile
                pl.BlockSpec((tk, tn), lambda i, j, k: (k, j)),   # weight.T tile
            ],
            out_specs=pl.BlockSpec((tm, tn), lambda i, j, k: (i, j)),
            scratch_shapes=scratch,
        ),
        compiler_params=pltpu.CompilerParams(
            dimension_semantics=("parallel", "parallel", "arbitrary"),
            vmem_limit_bytes=vmem_limit,
        ),
    )(x_c, w_c)

    if m_pad != B or n_pad != N:
        return out_padded[:B, :N]
    return out_padded


if __name__ == "__main__":
    key = jax.random.PRNGKey(0)
    kx, kw, kx2, kw2, kx3, kw3 = jax.random.split(key, 6)

    # --- Small shapes consistent with the module (batch=8, input_dim=32, output_dim=16).
    batch, input_dim, output_dim = 8, 32, 16
    x = jax.random.normal(kx, (batch, input_dim), dtype=jnp.float32)

    # zero_init=True (module default): zero weight -> zero output.
    w_zero = jnp.zeros((output_dim, input_dim), dtype=jnp.float32)
    out_zero = jax.block_until_ready(regression_model_forward(x, w_zero))
    assert out_zero.shape == (batch, output_dim)
    assert jnp.allclose(out_zero, 0.0), "zero-init weight must give all-zero output"

    # Non-zero weight vs pure-JAX reference.
    w_rand = jax.random.normal(kw, (output_dim, input_dim), dtype=jnp.float32)
    out = jax.block_until_ready(regression_model_forward(x, w_rand))
    ref = x @ w_rand.T
    assert jnp.allclose(out, ref, atol=1e-5, rtol=1e-5), "mismatch vs reference linear"

    # --- Larger case: exercises the (M, N, K) grid, K-axis accumulation into the
    #     resident f32 output tile, and the 2-tile M split for the parallel axes.
    B2, K2, N2 = 256, 2048, 640
    x2 = jax.random.normal(kx2, (B2, K2), dtype=jnp.float32)
    w2 = jax.random.normal(kw2, (N2, K2), dtype=jnp.float32) * 0.03
    out2 = jax.block_until_ready(regression_model_forward(x2, w2))
    ref2 = x2 @ w2.T
    assert out2.shape == (B2, N2)
    assert jnp.allclose(out2, ref2, atol=2e-3, rtol=2e-3), "mismatch vs reference (tiled)"

    # --- Ragged case: non-aligned B/N exercises full-dim blocks + minimal padding path.
    B3, K3, N3 = 100, 384, 33
    x3 = jax.random.normal(kx3, (B3, K3), dtype=jnp.float32)
    w3 = jax.random.normal(kw3, (N3, K3), dtype=jnp.float32) * 0.05
    out3 = jax.block_until_ready(regression_model_forward(x3, w3))
    ref3 = x3 @ w3.T
    assert out3.shape == (B3, N3)
    assert jnp.allclose(out3, ref3, atol=2e-3, rtol=2e-3), "mismatch vs reference (ragged)"

    print("KERNEL_OK")
</pallas_src>

<mosaic_0001>
module attributes {stable_mosaic.version = 11 : i64} {
  func.func @_linear_kernel_single_k(%arg0: i32, %arg1: i32, %arg2: i32, %arg3: memref<8x32xf32, #tpu.memory_space<vmem>>, %arg4: memref<32x16xf32, #tpu.memory_space<vmem>>, %arg5: memref<8x16xf32, #tpu.memory_space<vmem>>) attributes {dimension_semantics = [#tpu.dimension_semantics<parallel>, #tpu.dimension_semantics<parallel>, #tpu.dimension_semantics<arbitrary>], iteration_bounds = array<i64: 1, 1, 1>, scalar_prefetch = 0 : i64, scratch_operands = 0 : i64, tpu.core_type = #tpu.core_type<tc>, window_params = [{transform_indices = @transform_0, window_bounds = array<i64: 8, 32>}, {transform_indices = @transform_1, window_bounds = array<i64: 32, 16>}, {transform_indices = @transform_2, window_bounds = array<i64: 8, 16>}]} {
    %c0 = arith.constant 0 : index
    %c0_0 = arith.constant 0 : index
    %0 = vector.load %arg3[%c0, %c0_0] : memref<8x32xf32, #tpu.memory_space<vmem>>, vector<8x32xf32>
    %c0_1 = arith.constant 0 : index
    %c0_2 = arith.constant 0 : index
    %1 = vector.load %arg4[%c0_1, %c0_2] : memref<32x16xf32, #tpu.memory_space<vmem>>, vector<32x16xf32>
    %cst = arith.constant dense<0.000000e+00> : vector<8x16xf32>
    %2 = tpu.matmul %0, %1, %cst {dimension_numbers = #tpu.dot_dimension_numbers<[1], [0], [0], [1], [0, 0, 1, 1], [], []>} : vector<8x32xf32>, vector<32x16xf32>, vector<8x16xf32> -> vector<8x16xf32>
    %c0_3 = arith.constant 0 : index
    %c0_4 = arith.constant 0 : index
    %3 = vector.load %arg5[%c0_3, %c0_4] : memref<8x16xf32, #tpu.memory_space<vmem>>, vector<8x16xf32>
    tpu.vector_store %arg5[%c0_3, %c0_4], %2 {strides = array<i32>} : memref<8x16xf32, #tpu.memory_space<vmem>>, vector<8x16xf32>,
    return
  }
  func.func @transform_0(%arg0: i32, %arg1: i32, %arg2: i32) -> (i32, i32) {
    %c0_i32 = arith.constant 0 : i32
    return %arg0, %arg2 : i32, i32
  }
  func.func @transform_1(%arg0: i32, %arg1: i32, %arg2: i32) -> (i32, i32) {
    %c0_i32 = arith.constant 0 : i32
    return %arg2, %arg1 : i32, i32
  }
  func.func @transform_2(%arg0: i32, %arg1: i32, %arg2: i32) -> (i32, i32) {
    %c0_i32 = arith.constant 0 : i32
    return %arg0, %arg1 : i32, i32
  }
}

</mosaic_0001>

<bundles_post_ra>
// kernel: tpu_custom_call.1
= control target key start
LH: loop header
LB: loop body
LE: loop exit
PB: predicated region body
PF: predicated region fallthrough
CT: control target
= control target key end

     0   :  { %s121_s0 = inlined_call_operand.vmem [shape: f32[8,32], index: 0, kind: input, shape index: {}]   ;;  %s122_s1 = inlined_call_operand.vmem [shape: f32[32,16], index: 1, kind: input, shape index: {}]   ;;  %s123_s2 = inlined_call_operand.hbm [shape: f32[8,16], index: 2, kind: output, shape index: {}]  }
   0x1   :  { %v16_v0 = vld [vmem:[%s122_s1 + $0x18] sm:$0xff]  ;;  %v15_v1 = vld [vmem:[%s122_s1 + $0x10] sm:$0xff] }
   0x2   :  { %33 = vmatpush.msra.mxu0 %v16_v0 }
   0x3   :  { %7 = vsyncpa [#allocation3], 0  ;;  %v14_v2 = vld [vmem:[%s122_s1 + $0x8] sm:$0xff]  ;;  %v13_v3 = vld [vmem:[%s122_s1] sm:$0xff]  ;;  %vm17_vm0 = vcmask 261120   ;;  %s87_s19 = smov [#allocation2]  }
   0x4   :  { %34 = vmatpush.msra.mxu0 %v15_v1  ;;  %v12_v4 = vld [vmem:[%s121_s0] sm:$0xff]  ;;  %s48_s20 = sshll.u32 %s87_s19, 4  ;;  %s50_s23 = sshll.u32 %s123_s2, 4  ;;  %vm41_vm1 = vcmask 130048   ;;  %s49_s20 = int_to_ptr.vmem [resolvable:$true] %s48_s20  ;;  %s51_s23 = int_to_ptr.hbm [resolvable:$true] %s50_s23 }
   0x6   :  { %35 = vmatpush.msra.mxu0 %v14_v2 }
   0x8   :  { %36 = vmatpush.msra.mxu0 %v13_v3 }
   0x9   :  { %59 = vmatmul.msk.f32.vlgmr.msra.gmra.mxu0 %vm17_vm0, %v12_v4 }
  0x86   :  { %v38_v5 = vpop.f32.mrf.mxu0 }
  0x87   :  { %42 = vst.msk [vmem:[#allocation2] sm:$0xff] %vm41_vm1, %v38_v5 }
  0x88   :  { %53 = dma.vmem_to_hbm [thread:$0]  %s49_s20, 128, %s51_s23, [#allocation3]  }
  0x89   :  { %85 = dma.done.wait [#allocation3], 128  }
  0x8a   :  { %86 = vsyncadd [#allocation3], 4294967168 }
  0x8b   :  { %58 = vsyncpa [#allocation3], 1 }

</bundles_post_ra>
